<compile_context>
chip_gen: v6e
topology: v6e:2x2x1
jax: 0.10.0
libtpu: 0.0.40
codegen_flags: <defaults>
</compile_context>

<pallas_src>
import functools

import jax
import jax.numpy as jnp
from jax import lax
from jax.experimental import pallas as pl
from jax.experimental.pallas import tpu as pltpu


def _round_up(x, m):
    return ((x + m - 1) // m) * m


def _focal_pow(q, gamma):
    """(1 - pt) ** gamma, specialized at trace time on the static gamma."""
    g = float(gamma)
    if g == 2.0:
        return q * q
    if g == 1.0:
        return q
    if g == 0.0:
        return jnp.ones_like(q)
    if g.is_integer() and g > 0:
        return lax.integer_pow(q, int(g))
    return jnp.power(q, g)  # non-integer gamma: 2 EUP transcendentals, [TN,1] only


def _focal_loss_kernel(x_ref, t_ref, w_ref, o_ref, num_acc, den_acc, *,
                       gamma, ignore_index, n_rows, tile_n):
    """One batch tile of the focal loss.

    x_ref:   [TILE_N, C] logits (native dtype, VMEM)
    t_ref:   [TILE_N, 1] int32 targets (VMEM)
    w_ref:   [1, C]      float32 class weights (VMEM, resident across tiles)
    o_ref:   [1, 1]      float32 scalar loss (written on last tile)
    num_acc / den_acc: [1, 1] float32 VMEM accumulators (persist across grid)
    """
    i = pl.program_id(0)

    @pl.when(i == 0)
    def _():
        num_acc[...] = jnp.zeros_like(num_acc)
        den_acc[...] = jnp.zeros_like(den_acc)

    x = x_ref[...].astype(jnp.float32)        # [TN, C]
    t = t_ref[...]                            # [TN, 1] int32
    w = w_ref[...]                            # [1,  C] f32

    tn, c = x.shape

    # log-softmax pieces, reduced to [TN, 1] per-row scalars (one exp pass
    # over the full [TN, C] tile; reductions run on the XLU slot).
    m = jnp.max(x, axis=1, keepdims=True)                          # [TN, 1]
    s = jnp.sum(jnp.exp(x - m), axis=1, keepdims=True)             # [TN, 1]
    lse = jnp.log(s)                                               # [TN, 1]

    # Gather target logit and class weight via one-hot (ignore_index never
    # matches a class, so those rows gather 0 — no OOB access).
    classes = lax.broadcasted_iota(jnp.int32, (tn, c), 1)
    onehot = (classes == t).astype(jnp.float32)                    # [TN, C]
    x_t = jnp.sum(x * onehot, axis=1, keepdims=True)               # [TN, 1]
    w_t = jnp.sum(w * onehot, axis=1, keepdims=True)               # [TN, 1]

    # Focal modulation entirely on [TN, 1].
    logpt_t = x_t - m - lse
    pt_t = jnp.exp(logpt_t)
    focal_t = _focal_pow(1.0 - pt_t, gamma) * logpt_t

    # Mask out ignore_index rows and padding rows of the (possibly partial)
    # last tile; jnp.where also blocks NaN/garbage from padded rows.
    rows = lax.broadcasted_iota(jnp.int32, (tn, 1), 0) + i * tile_n
    valid = jnp.logical_and(rows < n_rows, t != ignore_index)

    per_num = jnp.where(valid, -focal_t * w_t, 0.0)                # [TN, 1]
    per_den = jnp.where(valid, w_t, 0.0)                           # [TN, 1]

    num_acc[...] += jnp.sum(per_num, axis=0, keepdims=True)
    den_acc[...] += jnp.sum(per_den, axis=0, keepdims=True)

    @pl.when(i == pl.num_programs(0) - 1)
    def _():
        # NOTE: if every target == ignore_index the denominator is 0 and the
        # result is NaN/Inf — same as PyTorch's weighted-mean nll_loss.
        o_ref[...] = num_acc[...] / den_acc[...]


def focal_loss(x, target, weight=None, gamma=2.0, ignore_index=-100,
               tile_n=None):
    """Pallas TPU focal loss. x: [N, C] float, target: [N] int. Returns scalar."""
    n, c = x.shape
    t2 = target.reshape(n, 1).astype(jnp.int32)
    if weight is None:
        w2 = jnp.ones((1, c), jnp.float32)
    else:
        w2 = jnp.asarray(weight).reshape(1, c).astype(jnp.float32)

    if tile_n is None:
        # ~4 MiB of logits per tile (double-buffered ~8 MiB) keeps the working
        # set well under the default scoped-VMEM limit on v5e/v6e/v7x while
        # still amortizing the ~0.35 us per-grid-step overhead.
        bytes_per_row = c * x.dtype.itemsize
        tile_n = max(8, min(1024, (4 << 20) // max(1, bytes_per_row)))
        tile_n = max(8, (tile_n // 8) * 8)
    tile_n = min(tile_n, _round_up(n, 8))     # multiple of 8 (sublane rule)
    grid = pl.cdiv(n, tile_n)

    kernel = functools.partial(
        _focal_loss_kernel,
        gamma=float(gamma),
        ignore_index=int(ignore_index),
        n_rows=n,
        tile_n=tile_n,
    )

    out = pl.pallas_call(
        kernel,
        out_shape=jax.ShapeDtypeStruct((1, 1), jnp.float32),
        grid=(grid,),
        in_specs=[
            pl.BlockSpec((tile_n, c), lambda i: (i, 0)),   # logits, tiled over N
            pl.BlockSpec((tile_n, 1), lambda i: (i, 0)),   # targets, tiled over N
            pl.BlockSpec((1, c), lambda i: (0, 0)),        # class weights, resident
        ],
        out_specs=pl.BlockSpec((1, 1), lambda i: (0, 0)),  # resident scalar block
        scratch_shapes=[
            pltpu.VMEM((1, 1), jnp.float32),               # num accumulator
            pltpu.VMEM((1, 1), jnp.float32),               # den accumulator
        ],
        compiler_params=pltpu.CompilerParams(
            dimension_semantics=("arbitrary",),            # reduction axis
        ),
    )(x, t2, w2)
    return out[0, 0]


def _focal_loss_ref(x, target, weight=None, gamma=2.0, ignore_index=-100):
    """Pure-JAX reference mirroring the PyTorch module."""
    x = x.astype(jnp.float32)
    logpt = jax.nn.log_softmax(x, axis=1)
    pt = jnp.exp(logpt)
    logpt = (1.0 - pt) ** gamma * logpt
    n, c = x.shape
    if weight is None:
        weight = jnp.ones((c,), jnp.float32)
    else:
        weight = jnp.asarray(weight).astype(jnp.float32)
    safe_t = jnp.where(target == ignore_index, 0, target)
    picked = jnp.take_along_axis(logpt, safe_t[:, None], axis=1)[:, 0]
    w_t = weight[safe_t]
    valid = (target != ignore_index).astype(jnp.float32)
    num = jnp.sum(-picked * w_t * valid)
    den = jnp.sum(w_t * valid)
    return num / den


if __name__ == "__main__":
    key = jax.random.PRNGKey(0)
    k1, k2, k3 = jax.random.split(key, 3)

    # Case 1: small demo shape, no class weights.
    N, C = 64, 16
    x = jax.random.normal(k1, (N, C), dtype=jnp.float32)
    target = jax.random.randint(k2, (N,), 0, C, dtype=jnp.int32)
    target = target.at[3].set(-100)     # ignored rows (PyTorch nll_loss semantics)
    target = target.at[17].set(-100)

    loss = focal_loss(x, target, weight=None, gamma=2.0, ignore_index=-100)
    loss = jax.block_until_ready(loss)
    ref = _focal_loss_ref(x, target, weight=None, gamma=2.0, ignore_index=-100)
    assert jnp.allclose(loss, ref, rtol=1e-5, atol=1e-5), (loss, ref)

    # Case 2: N not divisible by the tile, class weights, non-default gamma —
    # exercises the partial-tile masking, the resident weight block and the
    # multi-tile accumulator path.
    N2, C2 = 100, 16
    x2 = jax.random.normal(k3, (N2, C2), dtype=jnp.float32)
    t2 = jax.random.randint(k2, (N2,), 0, C2, dtype=jnp.int32)
    t2 = t2.at[0].set(-100)
    w = jnp.linspace(0.5, 2.0, C2, dtype=jnp.float32)

    loss2 = focal_loss(x2, t2, weight=w, gamma=3.0, ignore_index=-100, tile_n=32)
    loss2 = jax.block_until_ready(loss2)
    ref2 = _focal_loss_ref(x2, t2, weight=w, gamma=3.0, ignore_index=-100)
    assert jnp.allclose(loss2, ref2, rtol=1e-5, atol=1e-5), (loss2, ref2)

    print("KERNEL_OK")
</pallas_src>

<mosaic_0001>
module attributes {stable_mosaic.version = 11 : i64} {
  func.func @_focal_loss_kernel(%arg0: i32, %arg1: memref<64x16xf32, #tpu.memory_space<vmem>>, %arg2: memref<64x1xi32, #tpu.memory_space<vmem>>, %arg3: memref<1x16xf32, #tpu.memory_space<vmem>>, %arg4: memref<1x1xf32, #tpu.memory_space<vmem>>, %arg5: memref<1x1xf32, #tpu.memory_space<vmem>>, %arg6: memref<1x1xf32, #tpu.memory_space<vmem>>) attributes {dimension_semantics = [#tpu.dimension_semantics<arbitrary>], iteration_bounds = array<i64: 1>, scalar_prefetch = 0 : i64, scratch_operands = 2 : i64, tpu.core_type = #tpu.core_type<tc>, window_params = [{transform_indices = @transform_0, window_bounds = array<i64: 64, 16>}, {transform_indices = @transform_1, window_bounds = array<i64: 64, 1>}, {pipeline_mode = #tpu.pipeline_mode<synchronous>, transform_indices = @transform_2, window_bounds = array<i64: 1, 16>}, {pipeline_mode = #tpu.pipeline_mode<synchronous>, transform_indices = @transform_3, window_bounds = array<i64: 1, 1>}]} {
    %c0_i32 = arith.constant 0 : i32
    %0 = arith.cmpi eq, %arg0, %c0_i32 : i32
    %1 = arith.extui %0 : i1 to i32
    %c0_i32_0 = arith.constant 0 : i32
    %2 = arith.cmpi ne, %1, %c0_i32_0 : i32
    scf.if %2 {
      %cst_26 = arith.constant 0.000000e+00 : f32
      %62 = vector.broadcast %cst_26 : f32 to vector<1x1xf32>
      %c0_27 = arith.constant 0 : index
      %c0_28 = arith.constant 0 : index
      %63 = vector.load %arg5[%c0_27, %c0_28] : memref<1x1xf32, #tpu.memory_space<vmem>>, vector<1x1xf32>
      tpu.vector_store %arg5[%c0_27, %c0_28], %62 {strides = array<i32>} : memref<1x1xf32, #tpu.memory_space<vmem>>, vector<1x1xf32>,
      %cst_29 = arith.constant 0.000000e+00 : f32
      %64 = vector.broadcast %cst_29 : f32 to vector<1x1xf32>
      %c0_30 = arith.constant 0 : index
      %c0_31 = arith.constant 0 : index
      %65 = vector.load %arg6[%c0_30, %c0_31] : memref<1x1xf32, #tpu.memory_space<vmem>>, vector<1x1xf32>
      tpu.vector_store %arg6[%c0_30, %c0_31], %64 {strides = array<i32>} : memref<1x1xf32, #tpu.memory_space<vmem>>, vector<1x1xf32>,
    } else {
    }
    %c0 = arith.constant 0 : index
    %c0_1 = arith.constant 0 : index
    %3 = vector.load %arg1[%c0, %c0_1] : memref<64x16xf32, #tpu.memory_space<vmem>>, vector<64x16xf32>
    %c0_2 = arith.constant 0 : index
    %c0_3 = arith.constant 0 : index
    %4 = vector.load %arg2[%c0_2, %c0_3] : memref<64x1xi32, #tpu.memory_space<vmem>>, vector<64x1xi32>
    %c0_4 = arith.constant 0 : index
    %c0_5 = arith.constant 0 : index
    %5 = vector.load %arg3[%c0_4, %c0_5] : memref<1x16xf32, #tpu.memory_space<vmem>>, vector<1x16xf32>
    %cst = arith.constant dense<0xFF800000> : vector<64xf32>
    %6 = vector.multi_reduction <maximumf>, %3, %cst [1] : vector<64x16xf32> to vector<64xf32>
    %7 = vector.shape_cast %6 : vector<64xf32> to vector<64x1xf32>
    %8 = vector.broadcast %7 : vector<64x1xf32> to vector<64x16xf32>
    %9 = arith.subf %3, %8 : vector<64x16xf32>
    %10 = math.exp %9 : vector<64x16xf32>
    %cst_6 = arith.constant dense<0.000000e+00> : vector<64xf32>
    %11 = vector.multi_reduction <add>, %10, %cst_6 [1] : vector<64x16xf32> to vector<64xf32>
    %12 = vector.shape_cast %11 : vector<64xf32> to vector<64x1xf32>
    %13 = math.log %12 : vector<64x1xf32>
    %14 = tpu.iota {dimensions = array<i32: 1>} : vector<64x16xi32>
    %15 = vector.broadcast %4 : vector<64x1xi32> to vector<64x16xi32>
    %16 = arith.cmpi eq, %14, %15 : vector<64x16xi32>
    %17 = arith.extui %16 : vector<64x16xi1> to vector<64x16xi32>
    %18 = arith.sitofp %17 : vector<64x16xi32> to vector<64x16xf32>
    %19 = arith.mulf %3, %18 : vector<64x16xf32>
    %cst_7 = arith.constant dense<0.000000e+00> : vector<64xf32>
    %20 = vector.multi_reduction <add>, %19, %cst_7 [1] : vector<64x16xf32> to vector<64xf32>
    %21 = vector.shape_cast %20 : vector<64xf32> to vector<64x1xf32>
    %22 = vector.broadcast %5 : vector<1x16xf32> to vector<64x16xf32>
    %23 = arith.mulf %22, %18 : vector<64x16xf32>
    %cst_8 = arith.constant dense<0.000000e+00> : vector<64xf32>
    %24 = vector.multi_reduction <add>, %23, %cst_8 [1] : vector<64x16xf32> to vector<64xf32>
    %25 = vector.shape_cast %24 : vector<64xf32> to vector<64x1xf32>
    %26 = arith.subf %21, %7 : vector<64x1xf32>
    %27 = arith.subf %26, %13 : vector<64x1xf32>
    %28 = math.exp %27 : vector<64x1xf32>
    %cst_9 = arith.constant 1.000000e+00 : f32
    %29 = vector.broadcast %cst_9 : f32 to vector<64x1xf32>
    %30 = arith.subf %29, %28 : vector<64x1xf32>
    %31 = arith.mulf %30, %30 : vector<64x1xf32>
    %32 = arith.mulf %31, %27 : vector<64x1xf32>
    %33 = tpu.iota {dimensions = array<i32: 0>} : vector<64x1xi32>
    %c64_i32 = arith.constant 64 : i32
    %34 = arith.muli %arg0, %c64_i32 : i32
    %35 = vector.broadcast %34 : i32 to vector<64x1xi32>
    %36 = arith.addi %33, %35 : vector<64x1xi32>
    %c64_i32_10 = arith.constant 64 : i32
    %37 = vector.broadcast %c64_i32_10 : i32 to vector<64x1xi32>
    %38 = arith.cmpi slt, %36, %37 : vector<64x1xi32>
    %c-100_i32 = arith.constant -100 : i32
    %39 = vector.broadcast %c-100_i32 : i32 to vector<64x1xi32>
    %40 = arith.cmpi ne, %4, %39 : vector<64x1xi32>
    %41 = arith.andi %38, %40 : vector<64x1xi1>
    %cst_11 = arith.constant 0.000000e+00 : f32
    %42 = vector.broadcast %cst_11 : f32 to vector<64x1xf32>
    %43 = arith.subf %42, %32 : vector<64x1xf32>
    %44 = arith.mulf %43, %25 : vector<64x1xf32>
    %cst_12 = arith.constant 0.000000e+00 : f32
    %45 = vector.broadcast %cst_12 : f32 to vector<64x1xf32>
    %46 = arith.select %41, %44, %45 : vector<64x1xi1>, vector<64x1xf32>
    %cst_13 = arith.constant 0.000000e+00 : f32
    %47 = vector.broadcast %cst_13 : f32 to vector<64x1xf32>
    %48 = arith.select %41, %25, %47 : vector<64x1xi1>, vector<64x1xf32>
    %c0_14 = arith.constant 0 : index
    %c0_15 = arith.constant 0 : index
    %49 = vector.load %arg5[%c0_14, %c0_15] : memref<1x1xf32, #tpu.memory_space<vmem>>, vector<1x1xf32>
    %cst_16 = arith.constant dense<0.000000e+00> : vector<1xf32>
    %50 = vector.multi_reduction <add>, %46, %cst_16 [0] : vector<64x1xf32> to vector<1xf32>
    %51 = vector.shape_cast %50 : vector<1xf32> to vector<1x1xf32>
    %52 = arith.addf %49, %51 : vector<1x1xf32>
    %c0_17 = arith.constant 0 : index
    %c0_18 = arith.constant 0 : index
    %53 = vector.load %arg5[%c0_17, %c0_18] : memref<1x1xf32, #tpu.memory_space<vmem>>, vector<1x1xf32>
    tpu.vector_store %arg5[%c0_17, %c0_18], %52 {strides = array<i32>} : memref<1x1xf32, #tpu.memory_space<vmem>>, vector<1x1xf32>,
    %c0_19 = arith.constant 0 : index
    %c0_20 = arith.constant 0 : index
    %54 = vector.load %arg6[%c0_19, %c0_20] : memref<1x1xf32, #tpu.memory_space<vmem>>, vector<1x1xf32>
    %cst_21 = arith.constant dense<0.000000e+00> : vector<1xf32>
    %55 = vector.multi_reduction <add>, %48, %cst_21 [0] : vector<64x1xf32> to vector<1xf32>
    %56 = vector.shape_cast %55 : vector<1xf32> to vector<1x1xf32>
    %57 = arith.addf %54, %56 : vector<1x1xf32>
    %c0_22 = arith.constant 0 : index
    %c0_23 = arith.constant 0 : index
    %58 = vector.load %arg6[%c0_22, %c0_23] : memref<1x1xf32, #tpu.memory_space<vmem>>, vector<1x1xf32>
    tpu.vector_store %arg6[%c0_22, %c0_23], %57 {strides = array<i32>} : memref<1x1xf32, #tpu.memory_space<vmem>>, vector<1x1xf32>,
    %c0_i32_24 = arith.constant 0 : i32
    %59 = arith.cmpi eq, %arg0, %c0_i32_24 : i32
    %60 = arith.extui %59 : i1 to i32
    %c0_i32_25 = arith.constant 0 : i32
    %61 = arith.cmpi ne, %60, %c0_i32_25 : i32
    scf.if %61 {
      %c0_26 = arith.constant 0 : index
      %c0_27 = arith.constant 0 : index
      %62 = vector.load %arg5[%c0_26, %c0_27] : memref<1x1xf32, #tpu.memory_space<vmem>>, vector<1x1xf32>
      %c0_28 = arith.constant 0 : index
      %c0_29 = arith.constant 0 : index
      %63 = vector.load %arg6[%c0_28, %c0_29] : memref<1x1xf32, #tpu.memory_space<vmem>>, vector<1x1xf32>
      %64 = arith.divf %62, %63 : vector<1x1xf32>
      %c0_30 = arith.constant 0 : index
      %c0_31 = arith.constant 0 : index
      %65 = vector.load %arg4[%c0_30, %c0_31] : memref<1x1xf32, #tpu.memory_space<vmem>>, vector<1x1xf32>
      tpu.vector_store %arg4[%c0_30, %c0_31], %64 {strides = array<i32>} : memref<1x1xf32, #tpu.memory_space<vmem>>, vector<1x1xf32>,
    } else {
    }
    return
  }
  func.func @transform_0(%arg0: i32) -> (i32, i32) {
    %c0_i32 = arith.constant 0 : i32
    %c0_i32_0 = arith.constant 0 : i32
    return %arg0, %c0_i32 : i32, i32
  }
  func.func @transform_1(%arg0: i32) -> (i32, i32) {
    %c0_i32 = arith.constant 0 : i32
    %c0_i32_0 = arith.constant 0 : i32
    return %arg0, %c0_i32 : i32, i32
  }
  func.func @transform_2(%arg0: i32) -> (i32, i32) {
    %c0_i32 = arith.constant 0 : i32
    %c0_i32_0 = arith.constant 0 : i32
    %c0_i32_1 = arith.constant 0 : i32
    return %c0_i32, %c0_i32_0 : i32, i32
  }
  func.func @transform_3(%arg0: i32) -> (i32, i32) {
    %c0_i32 = arith.constant 0 : i32
    %c0_i32_0 = arith.constant 0 : i32
    %c0_i32_1 = arith.constant 0 : i32
    return %c0_i32, %c0_i32_0 : i32, i32
  }
}

</mosaic_0001>

<bundles_post_ra>
// kernel: tpu_custom_call.1
= control target key start
LH: loop header
LB: loop body
LE: loop exit
PB: predicated region body
PF: predicated region fallthrough
CT: control target
= control target key end

     0   :  { %vm39_vm0 = vcmask 130048   ;;  %v537_v6 = vmov 0   ;;  %s845_s0 = inlined_call_operand.vmem [shape: f32[64,16], index: 0, kind: input, shape index: {}]   ;;  %s846_s1 = inlined_call_operand.vmem [shape: s32[64,1], index: 1, kind: input, shape index: {}]   ;;  %s847_s2 = inlined_call_operand.vmem [shape: f32[1,16], index: 2, kind: input, shape index: {}]   ;;  %s848_s3 = inlined_call_operand.hbm [shape: f32[1,1], index: 3, kind: output, shape index: {}]  }
   0x1   :  { %v563_v0 = vld [vmem:[%s845_s0 + $0x10] sm:$0xff]  ;;  %v568_v1 = vld [vmem:[%s845_s0] sm:$0xff]  ;;  %v573_v2 = vld [vmem:[%s845_s0 + $0x18] sm:$0xff]  ;;  %464 = vset.pattern.permute.xlu1 %v537_v6  ;;  %463 = vset.pattern.permute.xlu0 %v537_v6 }
   0x2   :  { %v46_v3 = vsel %vm39_vm0, %v563_v0, -inf  ;;  %v40_v4 = vsel %vm39_vm0, %v568_v1, -inf  ;;  %v582_v5 = vld [vmem:[%s845_s0 + $0x8] sm:$0xff]  ;;  %v49_v7 = vsel %vm39_vm0, %v573_v2, -inf  ;;  %v596_v10 = vld [vmem:[%s845_s0 + $0x20] sm:$0xff] }
   0x3   :  { %47 = vmax.xlane.f32.xlu1 %v46_v3  ;;  %41 = vmax.xlane.f32.xlu0 %v40_v4  ;;  %v43_v8 = vsel %vm39_vm0, %v582_v5, -inf  ;;  %v591_v9 = vld [vmem:[%s845_s0 + $0x28] sm:$0xff] }
   0x4   :  { %8 = vsyncpa [#allocation5], 0  ;;  %v55_v11 = vsel %vm39_vm0, %v591_v9, -inf  ;;  %v52_v12 = vsel %vm39_vm0, %v596_v10, -inf  ;;  %v605_v13 = vld [vmem:[%s845_s0 + $0x38] sm:$0xff]  ;;  %v610_v14 = vld [vmem:[%s845_s0 + $0x30] sm:$0xff]  ;;  %v128_v50 = vlaneseq }
   0x5   :  { %v61_v15 = vsel %vm39_vm0, %v605_v13, -inf  ;;  %v58_v16 = vsel %vm39_vm0, %v610_v14, -inf  ;;  %v619_v17 = vld [vmem:[%s846_s1 + $0x8] sm:$0xff]  ;;  %v625_v18 = vld [vmem:[%s846_s1 + $0x10] sm:$0xff]  ;;  %v630_v19 = vld [vmem:[%s846_s1] sm:$0xff]  ;;  %vm19_vm9 = vcmask 0  }
   0x6   :  { %v636_v20 = vld [vmem:[%s846_s1 + $0x18] sm:$0xff]  ;;  %v643_v21 = vld [vmem:[%s846_s1 + $0x20] sm:$0xff]  ;;  %v649_v22 = vld [vmem:[%s846_s1 + $0x28] sm:$0xff]  ;;  %v129_v55 = vand.u32 127, %v128_v50  ;;  %vm332_vm10 = vcmp.ne.s32.totalorder %v619_v17, 4294967196  ;;  %vm331_vm11 = vcmp.ne.s32.totalorder %v630_v19, 4294967196 }
   0x7   :  { %50 = vmax.xlane.f32.xlu1 %v49_v7  ;;  %44 = vmax.xlane.f32.xlu0 %v43_v8  ;;  %v655_v23 = vld [vmem:[%s846_s1 + $0x30] sm:$0xff]  ;;  %v661_v24 = vld [vmem:[%s846_s1 + $0x38] sm:$0xff]  ;;  %v538_v7 = vmov 0.0   ;;  %vm380_vm12 = vcmask 7168   ;;  %vm334_vm13 = vcmp.ne.s32.totalorder %v636_v20, 4294967196  ;;  %vm333_vm14 = vcmp.ne.s32.totalorder %v625_v18, 4294967196 }
   0x8   :  { %20 = vst.msk [vmem:[#allocation2] sm:$0x1] %vm19_vm9, %v538_v7  ;;  %21 = vst.msk [vmem:[#allocation3] sm:$0x1] %vm19_vm9, %v538_v7  ;;  %vm336_vm15 = vcmp.ne.s32.totalorder %v649_v22, 4294967196 }
   0xb   :  { %56 = vmax.xlane.f32.xlu1 %v55_v11  ;;  %53 = vmax.xlane.f32.xlu0 %v52_v12 }
   0xf   :  { %62 = vmax.xlane.f32.xlu1 %v61_v15  ;;  %59 = vmax.xlane.f32.xlu0 %v58_v16 }
  0x20   :  { %134 = vperm.xlu1 %464, %v619_v17  }
  0x24   :  { %137 = vperm.xlu1 %464, %v625_v18  }
  0x25   :  { %131 = vperm.xlu0 %463, %v630_v19  }
  0x28   :  { %140 = vperm.xlu1 %464, %v636_v20  }
  0x2c   :  { %143 = vperm.xlu1 %464, %v643_v21  }
  0x30   :  { %146 = vperm.xlu1 %464, %v649_v22  }
  0x34   :  { %149 = vperm.xlu1 %464, %v655_v23  }
  0x38   :  { %152 = vperm.xlu1 %464, %v661_v24  }
  0x8c   :  { %v664_v25 = vpop.xlane.xlu1 %47  ;;  %v666_v26 = vpop.xlane.xlu0 %41 }
  0x8d   :  { %v64_v27 = vsub.f32 %v568_v1, %v666_v26  ;;  %v66_v29 = vsub.f32 %v563_v0, %v664_v25 }
  0x8f   :  { %v72_v28 = vmul.f32 1.442695, %v64_v27  ;;  %v76_v36 = vmul.f32 1.442695, %v66_v29 }
  0x90   :  { %v672_v30 = vpop.xlane.xlu1 %50  ;;  %v674_v31 = vpop.xlane.xlu0 %44 }
  0x91   :  { %v67_v32 = vsub.f32 %v573_v2, %v672_v30  ;;  %v65_v33 = vsub.f32 %v582_v5, %v674_v31  ;;  %465 = vpow2.f32 %v72_v28 }
  0x93   :  { %v78_v34 = vmul.f32 1.442695, %v67_v32  ;;  %v74_v35 = vmul.f32 1.442695, %v65_v33 }
  0x94   :  { %v680_v37 = vpop.xlane.xlu1 %56  ;;  %v682_v38 = vpop.xlane.xlu0 %53 }
  0x95   :  { %467 = vpow2.f32 %v78_v34  ;;  %v69_v39 = vsub.f32 %v591_v9, %v680_v37  ;;  %v68_v40 = vsub.f32 %v596_v10, %v682_v38 }
  0x96   :  { %469 = vpow2.f32 %v74_v35 }
  0x97   :  { %v82_v41 = vmul.f32 1.442695, %v69_v39  ;;  %v80_v42 = vmul.f32 1.442695, %v68_v40  ;;  %471 = vpow2.f32 %v76_v36 }
  0x98   :  { %v688_v43 = vpop.xlane.xlu1 %62  ;;  %v690_v44 = vpop.xlane.xlu0 %59 }
  0x99   :  { %473 = vpow2.f32 %v82_v41  ;;  %v71_v45 = vsub.f32 %v605_v13, %v688_v43  ;;  %v70_v46 = vsub.f32 %v610_v14, %v690_v44 }
  0x9a   :  { %475 = vpow2.f32 %v80_v42 }
  0x9b   :  { %v86_v47 = vmul.f32 1.442695, %v71_v45  ;;  %v84_v48 = vmul.f32 1.442695, %v70_v46 }
  0x9c   :  { %v135_v49 = vpop.permute.xlu1 %134 }
  0x9d   :  { %477 = vpow2.f32 %v86_v47  ;;  %vm155_vm1 = vcmp.eq.s32.totalorder %v129_v55, %v135_v49 }
  0x9e   :  { %479 = vpow2.f32 %v84_v48  ;;  %v466_v51 = vpop.eup %465  ;;  %v452_v8 = vsel %vm155_vm1, 1.0, %v538_v7  ;;  %vm338_vm1 = vcmp.ne.s32.totalorder %v661_v24, 4294967196 }
  0x9f   :  { %v88_v53 = vsel %vm39_vm0, %v466_v51, 0.0  ;;  %v179_v29 = vmul.f32 %v452_v8, %v582_v5 }
  0xa0   :  { %v138_v52 = vpop.permute.xlu1 %137  ;;  %89 = vadd.xlane.f32.xlu1 %v88_v53  ;;  %v132_v61 = vpop.permute.xlu0 %131 }
  0xa1   :  { %vm154_vm2 = vcmp.eq.s32.totalorder %v129_v55, %v132_v61  ;;  %vm156_vm4 = vcmp.eq.s32.totalorder %v129_v55, %v138_v52  ;;  %v189_v36 = vsel %vm39_vm0, %v179_v29, 0.0 }
  0xa2   :  { %v468_v54 = vpop.eup %467  ;;  %v451_v27 = vsel %vm154_vm2, 1.0, %v538_v7  ;;  %v453_v40 = vsel %vm156_vm4, 1.0, %v538_v7  ;;  %vm337_vm2 = vcmp.ne.s32.totalorder %v655_v23, 4294967196 }
  0xa3   :  { %v470_v56 = vpop.eup %469  ;;  %v97_v57 = vsel %vm39_vm0, %v468_v54, 0.0  ;;  %v178_v34 = vmul.f32 %v451_v27, %v568_v1  ;;  %v180_v1 = vmul.f32 %v453_v40, %v563_v0  ;;  %v459_v0 = vld [vmem:[%s847_s2] ss:$0 sm:$0xff]  ;;  %s539_s2 = smov [#allocation4]  }
  0xa4   :  { %v141_v58 = vpop.permute.xlu1 %140  ;;  %v91_v59 = vsel %vm39_vm0, %v470_v56, 0.0  ;;  %v472_v60 = vpop.eup %471  ;;  %98 = vadd.xlane.f32.xlu1 %v97_v57  ;;  %v217_v54 = vmul.f32 %v459_v0, %v452_v8  ;;  %v216_v57 = vmul.f32 %v459_v0, %v451_v27  ;;  %v218_v61 = vmul.f32 %v459_v0, %v453_v40  ;;  %s443_s17 = sshll.u32 %s539_s2, 4  ;;  %s444_s17 = int_to_ptr.vmem [resolvable:$true] %s443_s17 }
  0xa5   :  { %92 = vadd.xlane.f32.xlu0 %v91_v59  ;;  %v94_v6 = vsel %vm39_vm0, %v472_v60, 0.0  ;;  %vm157_vm3 = vcmp.eq.s32.totalorder %v129_v55, %v141_v58  ;;  %v186_v5 = vsel %vm39_vm0, %v178_v34, 0.0  ;;  %v192_v49 = vsel %vm39_vm0, %v180_v1, 0.0  ;;  %s515_s18 = scalar_lea.vmem %s444_s17, 16  ;;  %s519_s19 = scalar_lea.vmem %s444_s17, 32 }
  0xa6   :  { %v474_v62 = vpop.eup %473  ;;  %v454_v32 = vsel %vm157_vm3, 1.0, %v538_v7  ;;  %v224_v59 = vsel %vm39_vm0, %v216_v57, 0.0  ;;  %p516_p0 = scmp.ne.s32.totalorder %s444_s17, %s515_s18  ;;  %p520_p1 = scmp.lt.s32.totalorder %s444_s17, %s444_s17 }
  0xa7   :  { %v476_v63 = vpop.eup %475  ;;  %v103_v3 = vsel %vm39_vm0, %v474_v62, 0.0  ;;  %v181_v39 = vmul.f32 %v454_v32, %v573_v2  ;;  %v219_v56 = vmul.f32 %v459_v0, %v454_v32  ;;  %v230_v62 = vsel %vm39_vm0, %v218_v61, 0.0  ;;  %p521_p2 = scmp.lt.s32.totalorder %s519_s19, %s515_s18 }
  0xa8   :  { %v144_v4 = vpop.permute.xlu1 %143  ;;  %104 = vadd.xlane.f32.xlu1 %v103_v3  ;;  %v100_v12 = vsel %vm39_vm0, %v476_v63, 0.0 }
  0xa9   :  { %95 = vadd.xlane.f32.xlu0 %v94_v6  ;;  %vm158_vm6 = vcmp.eq.s32.totalorder %v129_v55, %v144_v4  ;;  %v195_v45 = vsel %vm39_vm0, %v181_v39, 0.0  ;;  %v233_v58 = vsel %vm39_vm0, %v219_v56, 0.0  ;;  %p522_p3 = por %p521_p2, %p520_p1 }
  0xaa   :  { %v478_v11 = vpop.eup %477  ;;  %v455_v47 = vsel %vm158_vm6, 1.0, %v538_v7 }
  0xab   :  { %v480_v15 = vpop.eup %479  ;;  %v109_v16 = vsel %vm39_vm0, %v478_v11, 0.0  ;;  %v182_v51 = vmul.f32 %v455_v47, %v596_v10  ;;  %v220_v3 = vmul.f32 %v459_v0, %v455_v47  ;;  %p523_p4 = pnand %p522_p3, %p516_p0 }
  0xac   :  { %v147_v28 = vpop.permute.xlu1 %146  ;;  %110 = vadd.xlane.f32.xlu1 %v109_v16  ;;  %v106_v33 = vsel %vm39_vm0, %v480_v15, 0.0 }
  0xad   :  { %101 = vadd.xlane.f32.xlu0 %v100_v12  ;;  %vm159_vm5 = vcmp.eq.s32.totalorder %v129_v55, %v147_v28  ;;  %v198_v53 = vsel %vm39_vm0, %v182_v51, 0.0  ;;  %v236_v6 = vsel %vm39_vm0, %v220_v3, 0.0 }
  0xae   :  { %v456_v41 = vsel %vm159_vm5, 1.0, %v538_v7 }
  0xaf   :  { %v183_v46 = vmul.f32 %v456_v41, %v591_v9  ;;  %v221_v60 = vmul.f32 %v459_v0, %v456_v41 }
  0xb0   :  { %v150_v35 = vpop.permute.xlu1 %149  ;;  %190 = vadd.xlane.f32.xlu1 %v189_v36 }
  0xb1   :  { %107 = vadd.xlane.f32.xlu0 %v106_v33  ;;  %vm160_vm8 = vcmp.eq.s32.totalorder %v129_v55, %v150_v35  ;;  %v201_v48 = vsel %vm39_vm0, %v183_v46, 0.0 }
  0xb2   :  { %v457_v9 = vsel %vm160_vm8, 1.0, %v538_v7 }
  0xb3   :  { %v222_v8 = vmul.f32 %v459_v0, %v457_v9 }
  0xb4   :  { %v153_v42 = vpop.permute.xlu1 %152  ;;  %196 = vadd.xlane.f32.xlu1 %v195_v45 }
  0xb5   :  { %vm161_vm7 = vcmp.eq.s32.totalorder %v129_v55, %v153_v42  ;;  %187 = vadd.xlane.f32.xlu0 %v186_v5  ;;  %v184_v55 = vmul.f32 %v457_v9, %v610_v14  ;;  %v239_v14 = vsel %vm39_vm0, %v221_v60, 0.0  ;;  %v242_v11 = vsel %vm39_vm0, %v222_v8, 0.0 }
  0xb6   :  { %v458_v2 = vsel %vm161_vm7, 1.0, %v538_v7 }
  0xb7   :  { %v185_v50 = vmul.f32 %v458_v2, %v605_v13  ;;  %v227_v13 = vsel %vm39_vm0, %v217_v54, 0.0  ;;  %v204_v10 = vsel %vm39_vm0, %v184_v55, 0.0  ;;  %v223_v63 = vmul.f32 %v459_v0, %v458_v2 }
  0xb8   :  { %202 = vadd.xlane.f32.xlu1 %v201_v48 }
  0xb9   :  { %193 = vadd.xlane.f32.xlu0 %v192_v49  ;;  %v207_v52 = vsel %vm39_vm0, %v185_v50, 0.0  ;;  %v245_v4 = vsel %vm39_vm0, %v223_v63, 0.0  ;;  %vm335_vm0 = vcmp.ne.s32.totalorder %v643_v21, 4294967196 }
  0xbc   :  { %208 = vadd.xlane.f32.xlu1 %v207_v52 }
  0xbd   :  { %199 = vadd.xlane.f32.xlu0 %v198_v53 }
  0xc0   :  { %228 = vadd.xlane.f32.xlu1 %v227_v13 }
  0xc1   :  { %205 = vadd.xlane.f32.xlu0 %v204_v10 }
  0xc4   :  { %234 = vadd.xlane.f32.xlu1 %v233_v58 }
  0xc5   :  { %225 = vadd.xlane.f32.xlu0 %v224_v59 }
  0xc8   :  { %240 = vadd.xlane.f32.xlu1 %v239_v14 }
  0xc9   :  { %231 = vadd.xlane.f32.xlu0 %v230_v62 }
  0xcc   :  { %246 = vadd.xlane.f32.xlu1 %v245_v4 }
  0xcd   :  { %237 = vadd.xlane.f32.xlu0 %v236_v6 }
  0xd1   :  { %243 = vadd.xlane.f32.xlu0 %v242_v11 }
 0x129   :  { %v90_v12 = vpop.xlane.xlu1 %89 }
 0x12a   :  { %481 = vlog2.f32 %v90_v12 }
 0x12d   :  { %v99_v15 = vpop.xlane.xlu1 %98 }
 0x12e   :  { %v93_v16 = vpop.xlane.xlu0 %92  ;;  %483 = vlog2.f32 %v99_v15 }
 0x12f   :  { %485 = vlog2.f32 %v93_v16 }
 0x131   :  { %v105_v27 = vpop.xlane.xlu1 %104 }
 0x132   :  { %v96_v28 = vpop.xlane.xlu0 %95  ;;  %487 = vlog2.f32 %v105_v27 }
 0x133   :  { %489 = vlog2.f32 %v96_v28 }
 0x135   :  { %v111_v29 = vpop.xlane.xlu1 %110 }
 0x136   :  { %v102_v32 = vpop.xlane.xlu0 %101  ;;  %491 = vlog2.f32 %v111_v29 }
 0x137   :  { %493 = vlog2.f32 %v102_v32  ;;  %v482_v35 = vpop.eup %481 }
 0x138   :  { %v113_v45 = vmul.f32 0.6931472, %v482_v35 }
 0x139   :  { %v191_v34 = vpop.xlane.xlu1 %190 }
 0x13a   :  { %v108_v33 = vpop.xlane.xlu0 %107  ;;  %v249_v41 = vsub.f32 %v191_v34, %v674_v31 }
 0x13b   :  { %495 = vlog2.f32 %v108_v33  ;;  %v484_v36 = vpop.eup %483 }
 0x13c   :  { %v486_v7 = vpop.eup %485  ;;  %v119_v39 = vmul.f32 0.6931472, %v484_v36 }
 0x13d   :  { %v115_v40 = vmul.f32 0.6931472, %v486_v7  ;;  %v197_v5 = vpop.xlane.xlu1 %196 }
 0x13e   :  { %v188_v42 = vpop.xlane.xlu0 %187  ;;  %v251_v46 = vsub.f32 %v197_v5, %v672_v30 }
 0x13f   :  { %v248_v1 = vsub.f32 %v188_v42, %v666_v26  ;;  %v488_v47 = vpop.eup %487  ;;  %v746_v2 = vsub.f32 %v249_v41, %v115_v40 }
 0x140   :  { %v490_v48 = vpop.eup %489  ;;  %v123_v49 = vmul.f32 0.6931472, %v488_v47  ;;  %v748_v50 = vsub.f32 %v251_v46, %v119_v39 }
 0x141   :  { %v750_v51 = vsub.f32 %v248_v1, %v113_v45  ;;  %v117_v9 = vmul.f32 0.6931472, %v490_v48  ;;  %v266_v0 = vmul.f32 1.442695, %v746_v2  ;;  %v203_v31 = vpop.xlane.xlu1 %202 }
 0x142   :  { %v194_v52 = vpop.xlane.xlu0 %193  ;;  %v270_v53 = vmul.f32 1.442695, %v748_v50  ;;  %v253_v26 = vsub.f32 %v203_v31, %v680_v37 }
 0x143   :  { %v264_v30 = vmul.f32 1.442695, %v750_v51  ;;  %v250_v54 = vsub.f32 %v194_v52, %v664_v25  ;;  %v492_v55 = vpop.eup %491  ;;  %497 = vpow2.f32 %v266_v0 }
 0x144   :  { %v494_v13 = vpop.eup %493  ;;  %v127_v10 = vmul.f32 0.6931472, %v492_v55  ;;  %499 = vpow2.f32 %v270_v53  ;;  %v757_v56 = vsub.f32 %v253_v26, %v123_v49 }
 0x145   :  { %v759_v57 = vsub.f32 %v250_v54, %v117_v9  ;;  %v121_v58 = vmul.f32 0.6931472, %v494_v13  ;;  %501 = vpow2.f32 %v264_v30  ;;  %v209_v59 = vpop.xlane.xlu1 %208 }
 0x146   :  { %v200_v60 = vpop.xlane.xlu0 %199  ;;  %v274_v61 = vmul.f32 1.442695, %v757_v56  ;;  %v255_v37 = vsub.f32 %v209_v59, %v688_v43 }
 0x147   :  { %v268_v14 = vmul.f32 1.442695, %v759_v57  ;;  %v252_v25 = vsub.f32 %v200_v60, %v682_v38 }
 0x148   :  { %v496_v62 = vpop.eup %495  ;;  %503 = vpow2.f32 %v274_v61  ;;  %v765_v63 = vsub.f32 %v255_v37, %v127_v10 }
 0x149   :  { %v767_v3 = vsub.f32 %v252_v25, %v121_v58  ;;  %505 = vpow2.f32 %v268_v14  ;;  %v229_v4 = vpop.xlane.xlu1 %228  ;;  %v125_v8 = vmul.f32 0.6931472, %v496_v62 }
 0x14a   :  { %v206_v6 = vpop.xlane.xlu0 %205  ;;  %v278_v11 = vmul.f32 1.442695, %v765_v63  ;;  %v372_v16 = vsel %vm332_vm10, %v229_v4, 0.0 }
 0x14b   :  { %v272_v12 = vmul.f32 1.442695, %v767_v3  ;;  %v254_v15 = vsub.f32 %v206_v6, %v690_v44  ;;  %v407_v35 = vsel %vm380_vm12, %v372_v16, 0.0 }
 0x14c   :  { %507 = vpow2.f32 %v278_v11 }
 0x14d   :  { %v774_v38 = vsub.f32 %v254_v15, %v125_v8  ;;  %509 = vpow2.f32 %v272_v12  ;;  %v235_v28 = vpop.xlane.xlu1 %234 }
 0x14e   :  { %v226_v43 = vpop.xlane.xlu0 %225  ;;  %v374_v40 = vsel %vm334_vm13, %v235_v28, 0.0 }
 0x14f   :  { %v276_v27 = vmul.f32 1.442695, %v774_v38  ;;  %v371_v29 = vsel %vm331_vm11, %v226_v43, 0.0  ;;  %v411_v0 = vsel %vm380_vm12, %v374_v40, 0.0 }
 0x150   :  { %v406_v44 = vsel %vm380_vm12, %v371_v29, 0.0  ;;  %v498_v32 = vpop.eup %497 }
 0x151   :  { %511 = vpow2.f32 %v276_v27  ;;  %v500_v33 = vpop.eup %499  ;;  %v281_v34 = vsub.f32 1.0, %v498_v32  ;;  %v408_v41 = vadd.f32 %v407_v35, %v406_v44  ;;  %v241_v47 = vpop.xlane.xlu1 %240 }
 0x152   :  { %v232_v36 = vpop.xlane.xlu0 %231  ;;  %v502_v7 = vpop.eup %501  ;;  %v283_v39 = vsub.f32 1.0, %v500_v33 }
 0x153   :  { %v373_v5 = vsel %vm333_vm14, %v232_v36, 0.0  ;;  %v289_v42 = vmul.f32 %v281_v34, %v281_v34  ;;  %v280_v45 = vsub.f32 1.0, %v502_v7 }
 0x154   :  { %v409_v46 = vsel %vm380_vm12, %v373_v5, 0.0  ;;  %v291_v1 = vmul.f32 %v283_v39, %v283_v39 }
 0x155   :  { %v410_v48 = vadd.f32 %v409_v46, %v408_v41  ;;  %v504_v49 = vpop.eup %503  ;;  %v297_v9 = vmul.f32 %v289_v42, %v746_v2  ;;  %v288_v31 = vmul.f32 %v280_v45, %v280_v45  ;;  %v376_v2 = vsel %vm336_vm15, %v241_v47, 0.0  ;;  %v247_v11 = vpop.xlane.xlu1 %246 }
 0x156   :  { %v238_v52 = vpop.xlane.xlu0 %237  ;;  %v506_v53 = vpop.eup %505  ;;  %v299_v30 = vmul.f32 %v291_v1, %v748_v50  ;;  %v285_v26 = vsub.f32 1.0, %v504_v49  ;;  %v378_v34 = vsel %vm338_vm1, %v247_v11, 0.0 }
 0x157   :  { %v412_v54 = vadd.f32 %v411_v0, %v410_v48  ;;  %v348_v55 = vsub.f32 0.0, %v297_v9  ;;  %v296_v13 = vmul.f32 %v288_v31, %v750_v51  ;;  %v282_v10 = vsub.f32 1.0, %v506_v53 }
 0x158   :  { %v350_v58 = vsub.f32 0.0, %v299_v30  ;;  %v293_v59 = vmul.f32 %v285_v26, %v285_v26  ;;  %v375_v60 = vsel %vm335_vm0, %v238_v52, 0.0  ;;  %v419_v31 = vsel %vm380_vm12, %v378_v34, 0.0 }
 0x159   :  { %v508_v61 = vpop.eup %507  ;;  %v356_v14 = vmul.f32 %v348_v55, %v229_v4  ;;  %v347_v37 = vsub.f32 0.0, %v296_v13  ;;  %v290_v50 = vmul.f32 %v282_v10, %v282_v10  ;;  %v413_v25 = vsel %vm380_vm12, %v375_v60, 0.0 }
 0x15a   :  { %v510_v62 = vpop.eup %509  ;;  %v358_v6 = vmul.f32 %v350_v58, %v235_v28  ;;  %v301_v51 = vmul.f32 %v293_v59, %v757_v56  ;;  %v287_v8 = vsub.f32 1.0, %v508_v61  ;;  %v414_v12 = vadd.f32 %v413_v25, %v412_v54  ;;  %v244_v35 = vpop.xlane.xlu0 %243 }
 0x15b   :  { %v364_v15 = vsel %vm332_vm10, %v356_v14, 0.0  ;;  %v355_v16 = vmul.f32 %v347_v37, %v226_v43  ;;  %v298_v27 = vmul.f32 %v290_v50, %v759_v57  ;;  %v284_v29 = vsub.f32 1.0, %v510_v62 }
 0x15c   :  { %v352_v44 = vsub.f32 0.0, %v301_v51  ;;  %v415_v4 = vsel %vm380_vm12, %v376_v2, 0.0  ;;  %v295_v32 = vmul.f32 %v287_v8, %v287_v8  ;;  %v382_v43 = vsel %vm380_vm12, %v364_v15, 0.0  ;;  %v405_v8 = vld [vmem:[#allocation3] sm:$0x1] }
 0x15d   :  { %v363_v56 = vsel %vm331_vm11, %v355_v16, 0.0  ;;  %v349_v28 = vsub.f32 0.0, %v298_v27  ;;  %v292_v17 = vmul.f32 %v284_v29, %v284_v29  ;;  %v366_v40 = vsel %vm334_vm13, %v358_v6, 0.0  ;;  %v379_v27 = vld [vmem:[#allocation2] sm:$0x1] }
 0x15e   :  { %v512_v33 = vpop.eup %511  ;;  %v381_v57 = vsel %vm380_vm12, %v363_v56, 0.0  ;;  %v303_v7 = vmul.f32 %v295_v32, %v765_v63  ;;  %v416_v5 = vadd.f32 %v415_v4, %v414_v12  ;;  %v360_v45 = vmul.f32 %v352_v44, %v241_v47 }
 0x15f   :  { %v286_v39 = vsub.f32 1.0, %v512_v33  ;;  %v357_v41 = vmul.f32 %v349_v28, %v232_v36  ;;  %v300_v19 = vmul.f32 %v292_v17, %v767_v3  ;;  %v383_v42 = vadd.f32 %v382_v43, %v381_v57 }
 0x160   :  { %v377_v1 = vsel %vm337_vm2, %v244_v35, 0.0  ;;  %v354_v49 = vsub.f32 0.0, %v303_v7  ;;  %v386_v53 = vsel %vm380_vm12, %v366_v40, 0.0  ;;  %v368_v18 = vsel %vm336_vm15, %v360_v45, 0.0 }
 0x161   :  { %v294_v46 = vmul.f32 %v286_v39, %v286_v39  ;;  %v365_v48 = vsel %vm333_vm14, %v357_v41, 0.0  ;;  %v351_v9 = vsub.f32 0.0, %v300_v19  ;;  %v417_v63 = vsel %vm380_vm12, %v377_v1, 0.0 }
 0x162   :  { %v384_v20 = vsel %vm380_vm12, %v365_v48, 0.0  ;;  %v418_v0 = vadd.f32 %v417_v63, %v416_v5  ;;  %v362_v54 = vmul.f32 %v354_v49, %v247_v11  ;;  %v390_v2 = vsel %vm380_vm12, %v368_v18, 0.0 }
 0x163   :  { %v302_v36 = vmul.f32 %v294_v46, %v774_v38  ;;  %v385_v3 = vadd.f32 %v384_v20, %v383_v42  ;;  %v359_v47 = vmul.f32 %v351_v9, %v238_v52 }
 0x164   :  { %v420_v26 = vadd.f32 %v419_v31, %v418_v0  ;;  %v370_v22 = vsel %vm338_vm1, %v362_v54, 0.0 }
 0x165   :  { %v353_v30 = vsub.f32 0.0, %v302_v36  ;;  %v387_v55 = vadd.f32 %v386_v53, %v385_v3  ;;  %v367_v13 = vsel %vm335_vm0, %v359_v47, 0.0  ;;  %v394_v50 = vsel %vm380_vm12, %v370_v22, 0.0 }
 0x166   :  { %v388_v10 = vsel %vm380_vm12, %v367_v13, 0.0  ;;  %v421_v58 = vrot.slane %v420_v26, 4 }
 0x167   :  { %v361_v38 = vmul.f32 %v353_v30, %v244_v35  ;;  %v389_v59 = vadd.f32 %v388_v10, %v387_v55 }
 0x168   :  { %v422_v60 = vadd.f32 %v421_v58, %v420_v26 }
 0x169   :  { %v369_v52 = vsel %vm337_vm2, %v361_v38, 0.0  ;;  %v391_v61 = vadd.f32 %v390_v2, %v389_v59 }
 0x16a   :  { %v392_v14 = vsel %vm380_vm12, %v369_v52, 0.0  ;;  %v423_v37 = vrot.slane %v422_v60, 2 }
 0x16b   :  { %v393_v21 = vadd.f32 %v392_v14, %v391_v61 }
 0x16c   :  { %v424_v25 = vadd.f32 %v423_v37, %v422_v60 }
 0x16d   :  { %v395_v62 = vadd.f32 %v394_v50, %v393_v21 }
 0x16e   :  { %v425_v6 = vrot.slane %v424_v25, 1 }
 0x16f   :  { %v396_v51 = vrot.slane %v395_v62, 4 }
 0x170   :  { %v426_v11 = vadd.f32 %v425_v6, %v424_v25 }
 0x171   :  { %v397_v12 = vadd.f32 %v396_v51, %v395_v62 }
 0x172   :  { %v427_v23 = vadd.f32 %v426_v11, %v405_v8 }
 0x173   :  { %v398_v15 = vrot.slane %v397_v12, 2 }
 0x174   :  { %428 = vst.msk [vmem:[#allocation3] sm:$0x1] %vm19_vm9, %v427_v23 }
 0x175   :  { %v399_v24 = vadd.f32 %v398_v15, %v397_v12 }
 0x177   :  { %v400_v16 = vrot.slane %v399_v24, 1 }
 0x179   :  { %v401_v29 = vadd.f32 %v400_v16, %v399_v24 }
 0x17b   :  { %v402_v44 = vadd.f32 %v401_v29, %v379_v27  ;;  %v433_v4 = vld [vmem:[#allocation3] sm:$0x1] }
 0x17c   :  { %513 = vrcp.f32 %v433_v4 }
 0x17d   :  { %404 = vst.msk [vmem:[#allocation2] sm:$0x1] %vm19_vm9, %v402_v44 }
 0x184   :  { %v432_v32 = vld [vmem:[#allocation2] sm:$0x1] }
 0x189   :  { %v514_v33 = vpop.eup %513 }
 0x18a   :  { %v435_v56 = vmul.f32 %v514_v33, %v432_v32 }
 0x18c   :  { %436 = vst.msk [vmem:[#allocation4] sm:$0x1] %vm19_vm9, %v435_v56 }
 0x18d   :  { %526 = shalt.err (!%p523_p4)
}
 0x18e   :  { %446 = dma.vmem_to_hbm [thread:$0]  %s444_s17, 16, %s848_s3, [#allocation5]  }
 0x18f   :  { %535 = dma.done.wait [#allocation5], 16  }
 0x190   :  { %536 = vsyncadd [#allocation5], 4294967280 }
 0x191   :  { %450 = vsyncpa [#allocation5], 1 }

</bundles_post_ra>
